<compile_context>
chip_gen: v7x
topology: tpu7x:2x2x1
jax: 0.10.0
libtpu: 0.0.40
codegen_flags: <defaults>
</compile_context>

<pallas_src>
import jax
import jax.numpy as jnp
from jax import lax
from jax.experimental import pallas as pl
from jax.experimental.pallas import tpu as pltpu

_LANES = 128            # batch elements per packed row
_ROW = 2 * _LANES       # f32 elements per packed row (features interleaved)


def _round_up(n: int, m: int) -> int:
    return (n + m - 1) // m * m


def _linear_kernel(bias_ref, w_ref, x_ref, o_ref):
    """o = x_packed @ Wd + bias.

    bias_ref: SMEM (1,)        scalar bias
    w_ref   : VMEM (256, 128)  de-interleaving weights (constant across grid)
    x_ref   : VMEM (S, 256)    row r = 128 batch elements, features interleaved
    o_ref   : VMEM (S, 128)    dense output, lane k = batch element k of row r
    """
    o_ref[...] = (
        jnp.dot(
            x_ref[...],
            w_ref[...],
            preferred_element_type=jnp.float32,
            precision=lax.Precision.HIGHEST,
        )
        + bias_ref[0]
    )


def simple_model2_forward(x, weight, bias, *, block_rows: int = 4096):
    """y = x @ weight.T + bias, matching torch.nn.Linear(2, 1).

    x: (B, 2), weight: (1, 2), bias: (1,)  ->  (B, 1) float32.
    """
    B, in_features = x.shape
    assert in_features == 2 and weight.shape == (1, 2) and bias.shape == (1,)

    x = x.astype(jnp.float32)
    weight = weight.astype(jnp.float32)
    bias = bias.astype(jnp.float32)

    # Pad the batch to a multiple of 128 only when it is ragged; otherwise the
    # reshape below is a free, row-major metadata reshape (no copy at all).
    b_pad = _round_up(max(B, _LANES), _LANES)
    if b_pad != B:
        x = jnp.pad(x, ((0, b_pad - B), (0, 0)))
    nb = b_pad // _LANES                      # packed rows of 128 batch elems
    x_packed = x.reshape(nb, _ROW)            # zero-copy view of x

    # De-interleaving weight matrix: column k picks batch element k of a row.
    #   Wd[2k, k] = w00,  Wd[2k + 1, k] = w01, else 0.
    eye = jnp.eye(_LANES, dtype=jnp.float32)
    w_d = jnp.stack([weight[0, 0] * eye, weight[0, 1] * eye], axis=1)
    w_d = w_d.reshape(_ROW, _LANES)

    # Tile-row selection:
    #  * block must satisfy the (8,128) rule: multiple of 8 rows, or the full
    #    row extent for tiny inputs;
    #  * >= 2 grid steps whenever possible so ("parallel",) uses both v7x TCs;
    #  * capped at block_rows (default 4096 -> 6 MiB payload / grid step).
    block_rows = max(8, int(block_rows) // 8 * 8)
    if nb <= 8:
        s_rows = nb                                       # single full block
    else:
        s_rows = min(block_rows, _round_up(pl.cdiv(nb, 2), 8))
    grid = (pl.cdiv(nb, s_rows),)                         # last block may be ragged

    out = pl.pallas_call(
        _linear_kernel,
        out_shape=jax.ShapeDtypeStruct((nb, _LANES), jnp.float32),
        grid=grid,
        in_specs=[
            pl.BlockSpec(memory_space=pltpu.MemorySpace.SMEM),      # bias
            pl.BlockSpec((_ROW, _LANES), lambda i: (0, 0)),         # Wd (resident)
            pl.BlockSpec((s_rows, _ROW), lambda i: (i, 0)),         # x tile
        ],
        out_specs=pl.BlockSpec((s_rows, _LANES), lambda i: (i, 0)),  # dense out
        compiler_params=pltpu.CompilerParams(
            dimension_semantics=("parallel",),
            vmem_limit_bytes=32 * 1024 * 1024,
        ),
    )(bias, w_d, x_packed)

    y = out.reshape(b_pad, 1)                  # free: row-major flatten == batch order
    return y if b_pad == B else y[:B]


def init_params(key):
    """torch.nn.Linear-style U(-1/sqrt(fan_in), 1/sqrt(fan_in)) init."""
    in_features, out_features = 2, 1
    k_w, k_b = jax.random.split(key)
    bound = 1.0 / jnp.sqrt(jnp.float32(in_features))
    weight = jax.random.uniform(
        k_w, (out_features, in_features), jnp.float32, -bound, bound)
    bias = jax.random.uniform(
        k_b, (out_features,), jnp.float32, -bound, bound)
    return weight, bias


if __name__ == "__main__":
    key = jax.random.PRNGKey(0)
    k_x, k_p = jax.random.split(key)
    weight, bias = init_params(k_p)

    # Primary small shape: B = 256 -> zero-copy packed path, single grid step.
    x = jax.random.normal(k_x, (256, 2), jnp.float32)
    y = simple_model2_forward(x, weight, bias)
    jax.block_until_ready(y)
    y_ref = x @ weight.T + bias
    assert y.shape == (256, 1)
    assert jnp.allclose(y, y_ref, atol=1e-4, rtol=1e-4)

    # Ragged batch: exercises the (rare) pad + output-slice tail path.
    x2 = jax.random.normal(k_x, (1000, 2), jnp.float32)
    y2 = simple_model2_forward(x2, weight, bias)
    jax.block_until_ready(y2)
    assert jnp.allclose(y2, x2 @ weight.T + bias, atol=1e-4, rtol=1e-4)

    # Multi-step grid with a ragged last block (masked tail store path).
    x3 = jax.random.normal(k_x, (2560, 2), jnp.float32)
    y3 = simple_model2_forward(x3, weight, bias, block_rows=8)
    jax.block_until_ready(y3)
    assert jnp.allclose(y3, x3 @ weight.T + bias, atol=1e-4, rtol=1e-4)

    print("KERNEL_OK")
</pallas_src>

<mosaic_0001>
module attributes {stable_mosaic.version = 11 : i64} {
  func.func @_linear_kernel(%arg0: i32, %arg1: memref<1xf32, #tpu.memory_space<smem>>, %arg2: memref<256x128xf32, #tpu.memory_space<vmem>>, %arg3: memref<2x256xf32, #tpu.memory_space<vmem>>, %arg4: memref<2x128xf32, #tpu.memory_space<vmem>>) attributes {dimension_semantics = [#tpu.dimension_semantics<parallel>], iteration_bounds = array<i64: 1>, scalar_prefetch = 0 : i64, scratch_operands = 0 : i64, tpu.core_type = #tpu.core_type<tc>, window_params = [{transform_indices = @transform_0, window_bounds = array<i64: 1>}, {pipeline_mode = #tpu.pipeline_mode<synchronous>, transform_indices = @transform_1, window_bounds = array<i64: 256, 128>}, {transform_indices = @transform_2, window_bounds = array<i64: 2, 256>}, {transform_indices = @transform_3, window_bounds = array<i64: 2, 128>}]} {
    %c0 = arith.constant 0 : index
    %c0_0 = arith.constant 0 : index
    %0 = vector.load %arg3[%c0, %c0_0] : memref<2x256xf32, #tpu.memory_space<vmem>>, vector<2x256xf32>
    %c0_1 = arith.constant 0 : index
    %c0_2 = arith.constant 0 : index
    %1 = vector.load %arg2[%c0_1, %c0_2] : memref<256x128xf32, #tpu.memory_space<vmem>>, vector<256x128xf32>
    %cst = arith.constant dense<0.000000e+00> : vector<2x128xf32>
    %2 = tpu.matmul %0, %1, %cst {dimension_numbers = #tpu.dot_dimension_numbers<[1], [0], [0], [1], [0, 0, 1, 1], [], []>, precision = #tpu.contract_precision<fp32>} : vector<2x256xf32>, vector<256x128xf32>, vector<2x128xf32> -> vector<2x128xf32>
    %c0_3 = arith.constant 0 : index
    %3 = memref.load %arg1[%c0_3] : memref<1xf32, #tpu.memory_space<smem>>
    %4 = vector.broadcast %3 : f32 to vector<2x128xf32>
    %5 = arith.addf %2, %4 : vector<2x128xf32>
    %c0_4 = arith.constant 0 : index
    %c0_5 = arith.constant 0 : index
    %6 = vector.load %arg4[%c0_4, %c0_5] : memref<2x128xf32, #tpu.memory_space<vmem>>, vector<2x128xf32>
    tpu.vector_store %arg4[%c0_4, %c0_5], %5 {strides = array<i32>} : memref<2x128xf32, #tpu.memory_space<vmem>>, vector<2x128xf32>,
    return
  }
  func.func @transform_0(%arg0: i32) -> i32 {
    %c0_i32 = arith.constant 0 : i32
    %c0_i32_0 = arith.constant 0 : i32
    return %c0_i32 : i32
  }
  func.func @transform_1(%arg0: i32) -> (i32, i32) {
    %c0_i32 = arith.constant 0 : i32
    %c0_i32_0 = arith.constant 0 : i32
    %c0_i32_1 = arith.constant 0 : i32
    return %c0_i32, %c0_i32_0 : i32, i32
  }
  func.func @transform_2(%arg0: i32) -> (i32, i32) {
    %c0_i32 = arith.constant 0 : i32
    %c0_i32_0 = arith.constant 0 : i32
    return %arg0, %c0_i32 : i32, i32
  }
  func.func @transform_3(%arg0: i32) -> (i32, i32) {
    %c0_i32 = arith.constant 0 : i32
    %c0_i32_0 = arith.constant 0 : i32
    return %arg0, %c0_i32 : i32, i32
  }
}

</mosaic_0001>

<bundles_post_ra>
// kernel: tpu_custom_call.1
= control target key start
LH: loop header
LB: loop body
LE: loop exit
PB: predicated region body
PF: predicated region fallthrough
CT: control target
= control target key end

     0   :  { %9 = vsyncpa [#allocation4], 0  ;;  %s1863_s0 = inlined_call_operand.<no memory space> [shape: f32[1], index: 0, kind: input, shape index: {}]   ;;  %s1864_s1 = inlined_call_operand.hbm [shape: f32[256,128], index: 1, kind: input, shape index: {}]   ;;  %s1865_s2 = inlined_call_operand.vmem [shape: f32[2,256], index: 2, kind: input, shape index: {}]   ;;  %s1866_s3 = inlined_call_operand.hbm [shape: f32[2,128], index: 3, kind: output, shape index: {}]  }
   0x1   :  { %10 = vsyncpa [#allocation5], 0  ;;  %s1409_s12 = smov [#allocation3]   ;;  %s1361_s16 = scalar_lea.hbm %s1864_s1, 4096 }
   0x2   :  { %s18_s13 = sshll.u32 %s1409_s12, 4  ;;  %p1362_p0 = scmp.ne.s32.totalorder %s1864_s1, %s1361_s16  ;;  %s19_s13 = int_to_ptr.vmem [resolvable:$true] %s18_s13 }
   0x3   :  { %p1365_p1 = scmp.lt.u32.totalorder %s1361_s16, %s1864_s1 }
   0x5   :  { %p1367_p2 = pnand %p1365_p1, %p1362_p0 }
   0x7   :  { %1370 = shalt.err (!%p1367_p2)
}
   0x8   :  { %s1371_s21 = scalar_lea.vmem %s19_s13, 4096  ;;  %p1376_p4 = scmp.lt.s32.totalorder %s19_s13, %s19_s13 }
   0x9   :  { %p1372_p3 = scmp.ne.s32.totalorder %s19_s13, %s1371_s21  ;;  %p1377_p5 = scmp.lt.s32.totalorder %s1371_s21, %s1371_s21 }
   0xb   :  { %p1378_p6 = por %p1377_p5, %p1376_p4 }
   0xd   :  { %p1379_p7 = pnand %p1378_p6, %p1372_p3 }
   0xf   :  { %1382 = shalt.err (!%p1379_p7)
}
  0x10   :  { %s1410_s22 = smov 128   ;;  %s1411_s23 = smov 8  }
  0x11   :  { %24 = dma.hbm_to_vmem [thread:$0]  %s1864_s1, 4096, %s19_s13, [#allocation4], %s1410_s22, %s1410_s22, %s1411_s23  }
  0x12   :  { %1405 = dma.done.wait [#allocation4], 4096  }
  0x13   :  { %1406 = vsyncadd [#allocation4], 4294963200  ;;  %v47_v0 = vld [vmem:[#allocation3 + $0x80] sm:$0xff]  ;;  %v48_v1 = vld [vmem:[#allocation3 + $0x88] sm:$0xff] }
  0x14   :  { %v31_v2 = vld [vmem:[#allocation3] sm:$0xff]  ;;  %v125_v3 = vand.u32 4294901760, %v47_v0  ;;  %v128_v4 = vand.u32 4294901760, %v48_v1  ;;  %v32_v5 = vld [vmem:[#allocation3 + $0x8] sm:$0xff]  ;;  %v49_v7 = vld [vmem:[#allocation3 + $0x90] sm:$0xff] }
  0x15   :  { %v77_v6 = vand.u32 4294901760, %v31_v2  ;;  %v50_v8 = vld [vmem:[#allocation3 + $0x98] sm:$0xff]  ;;  %v80_v9 = vand.u32 4294901760, %v32_v5  ;;  %v131_v10 = vand.u32 4294901760, %v49_v7  ;;  %v33_v12 = vld [vmem:[#allocation3 + $0x10] sm:$0xff]  ;;  %v51_v18 = vld [vmem:[#allocation3 + $0xa0] sm:$0xff] }
  0x16   :  { %v134_v11 = vand.u32 4294901760, %v50_v8  ;;  %v34_v13 = vld [vmem:[#allocation3 + $0x18] sm:$0xff]  ;;  %v1445_v14 = vpack.c.bf16 %v128_v4, %v125_v3  ;;  %v83_v16 = vand.u32 4294901760, %v33_v12  ;;  %v52_v19 = vld [vmem:[#allocation3 + $0xa8] sm:$0xff]  ;;  %v35_v23 = vld [vmem:[#allocation3 + $0x20] sm:$0xff]  ;;  %v137_v29 = vand.u32 4294901760, %v51_v18 }
  0x17   :  { %v1447_v15 = vsub.f32 %v31_v2, %v77_v6  ;;  %v86_v17 = vand.u32 4294901760, %v34_v13  ;;  %v1449_v20 = vpack.c.bf16 %v80_v9, %v77_v6  ;;  %v1451_v21 = vsub.f32 %v32_v5, %v80_v9  ;;  %v36_v24 = vld [vmem:[#allocation3 + $0x28] sm:$0xff]  ;;  %v53_v37 = vld [vmem:[#allocation3 + $0xb0] sm:$0xff]  ;;  %v54_v42 = vld [vmem:[#allocation3 + $0xb8] sm:$0xff] }
  0x18   :  { %v1453_v22 = vpack.c.bf16 %v134_v11, %v131_v10  ;;  %1166 = vmatprep.subr.bf16.mxu0 %v1445_v14  ;;  %v1456_v25 = vsub.f32 %v49_v7, %v131_v10  ;;  %v1458_v26 = vsub.f32 %v50_v8, %v134_v11  ;;  %v1462_v28 = vsub.f32 %v33_v12, %v83_v16  ;;  %v37_v55 = vld [vmem:[#allocation3 + $0x30] sm:$0xff]  ;;  %v38_v56 = vld [vmem:[#allocation3 + $0x38] sm:$0xff]  ;;  %v55_v5 = vld [vmem:[#allocation3 + $0xc0] sm:$0xff] }
  0x19   :  { %v1460_v27 = vpack.c.bf16 %v86_v17, %v83_v16  ;;  %1168 = vmatpush3.bf16.msra.mxu0 %v1449_v20  ;;  %v140_v30 = vand.u32 4294901760, %v52_v19  ;;  %v1465_v31 = vsub.f32 %v47_v0, %v125_v3  ;;  %v1467_v32 = vsub.f32 %v48_v1, %v128_v4  ;;  %v56_v6 = vld [vmem:[#allocation3 + $0xc8] sm:$0xff]  ;;  %v39_v11 = vld [vmem:[#allocation3 + $0x40] sm:$0xff] }
  0x1a   :  { %1170 = vmatprep.subr.bf16.mxu0 %v1453_v22  ;;  %v89_v33 = vand.u32 4294901760, %v35_v23  ;;  %v92_v34 = vand.u32 4294901760, %v36_v24  ;;  %v1882_v35 = vand.u32 4294901760, %v1447_v15  ;;  %v1881_v36 = vand.u32 4294901760, %v1451_v21 }
  0x1b   :  { %v1472_v38 = vsub.f32 %v34_v13, %v86_v17  ;;  %v1474_v39 = vpack.c.bf16 %v140_v30, %v137_v29  ;;  %v1476_v40 = vsub.f32 %v51_v18, %v137_v29  ;;  %v1887_v41 = vand.u32 4294901760, %v1465_v31  ;;  %v40_v29 = vld [vmem:[#allocation3 + $0x48] sm:$0xff] }
  0x1c   :  { %v1479_v43 = vsub.f32 %v52_v19, %v140_v30  ;;  %v1884_v44 = vand.u32 4294901760, %v1467_v32  ;;  %v1482_v45 = vpack.c.bf16 %v92_v34, %v89_v33  ;;  %v1484_v46 = vsub.f32 %v35_v23, %v89_v33 }
  0x1d   :  { %1172 = vmatpush3.bf16.msra.mxu0 %v1460_v27  ;;  %v304_v47 = vsub.f32 %v1465_v31, %v1887_v41  ;;  %v192_v48 = vsub.f32 %v1447_v15, %v1882_v35  ;;  %v199_v49 = vsub.f32 %v1451_v21, %v1881_v36  ;;  %v143_v50 = vand.u32 4294901760, %v53_v37 }
  0x1e   :  { %1174 = vmatprep.subr.bf16.mxu0 %v1474_v39  ;;  %v311_v51 = vsub.f32 %v1467_v32, %v1884_v44  ;;  %v146_v52 = vand.u32 4294901760, %v54_v42  ;;  %v1879_v53 = vand.u32 4294901760, %v1456_v25  ;;  %v1877_v54 = vand.u32 4294901760, %v1458_v26 }
  0x1f   :  { %v305_v57 = vand.u32 4294901760, %v304_v47  ;;  %v1502_v58 = vsub.f32 %v36_v24, %v92_v34  ;;  %v193_v59 = vand.u32 4294901760, %v192_v48  ;;  %v200_v60 = vand.u32 4294901760, %v199_v49 }
  0x20   :  { %v312_v61 = vand.u32 4294901760, %v311_v51  ;;  %v1504_v62 = vpack.c.bf16 %v146_v52, %v143_v50  ;;  %v1506_v63 = vsub.f32 %v53_v37, %v143_v50  ;;  %v318_v0 = vsub.f32 %v1456_v25, %v1879_v53 }
  0x21   :  { %1176 = vmatpush3.bf16.msra.mxu0 %v1482_v45  ;;  %v1199_v1 = vpack.c.bf16 %v200_v60, %v193_v59  ;;  %v325_v2 = vsub.f32 %v1458_v26, %v1877_v54  ;;  %v95_v3 = vand.u32 4294901760, %v37_v55  ;;  %v98_v4 = vand.u32 4294901760, %v38_v56  ;;  %v58_v59 = vld [vmem:[#allocation3 + $0xd8] sm:$0xff] }
  0x22   :  { %v1197_v7 = vpack.c.bf16 %v312_v61, %v305_v57  ;;  %1178 = vmatprep.subr.bf16.mxu0 %v1504_v62  ;;  %v319_v8 = vand.u32 4294901760, %v318_v0  ;;  %v1876_v9 = vand.u32 4294901760, %v1462_v28  ;;  %v1874_v10 = vand.u32 4294901760, %v1472_v38  ;;  %v57_v57 = vld [vmem:[#allocation3 + $0xd0] sm:$0xff]  ;;  %v62_v54 = vld [vmem:[#allocation3 + $0xf8] sm:$0xff] }
  0x23   :  { %v1518_v12 = vsub.f32 %v54_v42, %v146_v52  ;;  %v326_v13 = vand.u32 4294901760, %v325_v2  ;;  %v1520_v16 = vpack.c.bf16 %v98_v4, %v95_v3  ;;  %v1522_v17 = vsub.f32 %v37_v55, %v95_v3 }
  0x24   :  { %1198 = vmatprep.subr.bf16.mxu1 %v1197_v7  ;;  %v206_v18 = vsub.f32 %v1462_v28, %v1876_v9  ;;  %v213_v19 = vsub.f32 %v1472_v38, %v1874_v10  ;;  %v149_v23 = vand.u32 4294901760, %v55_v5  ;;  %v152_v24 = vand.u32 4294901760, %v56_v6  ;;  %v61_v9 = vld [vmem:[#allocation3 + $0xf0] sm:$0xff] }
  0x25   :  { %1200 = vmatpush3.bf16.msra.mxu1 %v1199_v1  ;;  %v1201_v30 = vpack.c.bf16 %v326_v13, %v319_v8  ;;  %1180 = vmatpush3.bf16.msra.mxu0 %v1520_v16  ;;  %v1872_v33 = vand.u32 4294901760, %v1476_v40  ;;  %v1871_v34 = vand.u32 4294901760, %v1479_v43  ;;  %v101_v37 = vand.u32 4294901760, %v39_v11  ;;  %v41_v1 = vld [vmem:[#allocation3 + $0x50] sm:$0xff] }
  0x26   :  { %v1533_v42 = vsub.f32 %v38_v56, %v98_v4  ;;  %v207_v47 = vand.u32 4294901760, %v206_v18  ;;  %v214_v48 = vand.u32 4294901760, %v213_v19  ;;  %v1535_v49 = vpack.c.bf16 %v152_v24, %v149_v23  ;;  %v42_v18 = vld [vmem:[#allocation3 + $0x58] sm:$0xff] }
  0x27   :  { %1202 = vmatprep.subr.bf16.mxu1 %v1201_v30  ;;  %v1537_v50 = vsub.f32 %v55_v5, %v149_v23  ;;  %v332_v51 = vsub.f32 %v1476_v40, %v1872_v33  ;;  %v339_v52 = vsub.f32 %v1479_v43, %v1871_v34  ;;  %v104_v55 = vand.u32 4294901760, %v40_v29 }
  0x28   :  { %v1203_v56 = vpack.c.bf16 %v214_v48, %v207_v47  ;;  %1182 = vmatprep.subr.bf16.mxu0 %v1535_v49  ;;  %v1546_v60 = vsub.f32 %v56_v6, %v152_v24  ;;  %v1869_v61 = vand.u32 4294901760, %v1484_v46  ;;  %v1867_v0 = vand.u32 4294901760, %v1502_v58 }
  0x29   :  { %v333_v2 = vand.u32 4294901760, %v332_v51  ;;  %v340_v3 = vand.u32 4294901760, %v339_v52  ;;  %v1550_v4 = vpack.c.bf16 %v104_v55, %v101_v37  ;;  %v1552_v5 = vsub.f32 %v39_v11, %v101_v37 }
  0x2a   :  { %1204 = vmatpush3.bf16.msra.mxu1 %v1203_v56  ;;  %v220_v7 = vsub.f32 %v1484_v46, %v1869_v61  ;;  %v227_v6 = vsub.f32 %v1502_v58, %v1867_v0  ;;  %v155_v8 = vand.u32 4294901760, %v57_v57  ;;  %v158_v13 = vand.u32 4294901760, %v58_v59  ;;  %v60_v0 = vld [vmem:[#allocation3 + $0xe8] sm:$0xff] }
  0x2b   :  { %v1205_v19 = vpack.c.bf16 %v340_v3, %v333_v2  ;;  %1184 = vmatpush3.bf16.msra.mxu0 %v1550_v4  ;;  %v1868_v23 = vand.u32 4294901760, %v1506_v63  ;;  %v1870_v11 = vand.u32 4294901760, %v1518_v12  ;;  %v107_v24 = vand.u32 4294901760, %v41_v1  ;;  %v59_v3 = vld [vmem:[#allocation3 + $0xe0] sm:$0xff] }
  0x2c   :  { %v1563_v30 = vsub.f32 %v40_v29, %v104_v55  ;;  %v221_v37 = vand.u32 4294901760, %v220_v7  ;;  %v228_v47 = vand.u32 4294901760, %v227_v6  ;;  %v1565_v48 = vpack.c.bf16 %v158_v13, %v155_v8  ;;  %v43_v6 = vld [vmem:[#allocation3 + $0x60] sm:$0xff] }
  0x2d   :  { %1206 = vmatprep.subr.bf16.mxu1 %v1205_v19  ;;  %v1567_v51 = vsub.f32 %v57_v57, %v155_v8  ;;  %v346_v52 = vsub.f32 %v1506_v63, %v1868_v23  ;;  %v353_v56 = vsub.f32 %v1518_v12, %v1870_v11  ;;  %v110_v2 = vand.u32 4294901760, %v42_v18  ;;  %v44_v11 = vld [vmem:[#allocation3 + $0x68] sm:$0xff] }
  0x2e   :  { %v1207_v29 = vpack.c.bf16 %v228_v47, %v221_v37  ;;  %1186 = vmatprep.subr.bf16.mxu0 %v1565_v48  ;;  %v1576_v55 = vsub.f32 %v58_v59, %v158_v13  ;;  %v1873_v7 = vand.u32 4294901760, %v1522_v17  ;;  %v1875_v57 = vand.u32 4294901760, %v1533_v42 }
  0x2f   :  { %v347_v8 = vand.u32 4294901760, %v346_v52  ;;  %v354_v19 = vand.u32 4294901760, %v353_v56  ;;  %v1580_v23 = vpack.c.bf16 %v110_v2, %v107_v24  ;;  %v1582_v61 = vsub.f32 %v41_v1, %v107_v24 }
  0x30   :  { %1208 = vmatpush3.bf16.msra.mxu1 %v1207_v29  ;;  %v234_v37 = vsub.f32 %v1522_v17, %v1873_v7  ;;  %v241_v59 = vsub.f32 %v1533_v42, %v1875_v57  ;;  %v161_v13 = vand.u32 4294901760, %v59_v3  ;;  %v164_v47 = vand.u32 4294901760, %v60_v0 }
  0x31   :  { %v1209_v34 = vpack.c.bf16 %v354_v19, %v347_v8  ;;  %1188 = vmatpush3.bf16.msra.mxu0 %v1580_v23  ;;  %v1878_v52 = vand.u32 4294901760, %v1537_v50  ;;  %v1880_v1 = vand.u32 4294901760, %v1546_v60  ;;  %v113_v24 = vand.u32 4294901760, %v43_v6 }
  0x32   :  { %v1593_v56 = vsub.f32 %v42_v18, %v110_v2  ;;  %v235_v29 = vand.u32 4294901760, %v234_v37  ;;  %v242_v33 = vand.u32 4294901760, %v241_v59  ;;  %v1595_v7 = vpack.c.bf16 %v164_v47, %v161_v13  ;;  %v45_v37 = vld [vmem:[#allocation3 + $0x70] sm:$0xff] }
  0x33   :  { %1210 = vmatprep.subr.bf16.mxu1 %v1209_v34  ;;  %v1597_v10 = vsub.f32 %v59_v3, %v161_v13  ;;  %v360_v8 = vsub.f32 %v1537_v50, %v1878_v52  ;;  %v367_v19 = vsub.f32 %v1546_v60, %v1880_v1  ;;  %v116_v57 = vand.u32 4294901760, %v44_v11  ;;  %v46_v1 = vld [vmem:[#allocation3 + $0x78] sm:$0xff] }
  0x34   :  { %1910 = vst [vmem:[#allocation9_spill] sm:$0xff] %v1595_v7  ;;  %v1211_v18 = vpack.c.bf16 %v242_v33, %v235_v29  ;;  %1190 = vmatprep.subr.bf16.mxu0 %v1595_v7  ;;  %v1606_v2 = vsub.f32 %v60_v0, %v164_v47  ;;  %v1883_v34 = vand.u32 4294901760, %v1552_v5  ;;  %v1885_v3 = vand.u32 4294901760, %v1563_v30 }
  0x35   :  { %v361_v59 = vand.u32 4294901760, %v360_v8  ;;  %v368_v13 = vand.u32 4294901760, %v367_v19  ;;  %v1610_v52 = vpack.c.bf16 %v116_v57, %v113_v24  ;;  %v1612_v53 = vsub.f32 %v43_v6, %v113_v24 }
  0x36   :  { %1212 = vmatpush3.bf16.msra.mxu1 %v1211_v18  ;;  %v248_v33 = vsub.f32 %v1552_v5, %v1883_v34  ;;  %v255_v0 = vsub.f32 %v1563_v30, %v1885_v3  ;;  %v167_v47 = vand.u32 4294901760, %v61_v9  ;;  %v170_v29 = vand.u32 4294901760, %v62_v54 }
  0x37   :  { %1911 = vst [vmem:[#allocation10_spill] sm:$0xff] %v1610_v52  ;;  %v1213_v36 = vpack.c.bf16 %v368_v13, %v361_v59  ;;  %1192 = vmatpush3.bf16.msra.mxu0 %v1610_v52  ;;  %v1886_v8 = vand.u32 4294901760, %v1567_v51  ;;  %v1888_v6 = vand.u32 4294901760, %v1576_v55  ;;  %v119_v24 = vand.u32 4294901760, %v45_v37 }
  0x38   :  { %v1623_v19 = vsub.f32 %v44_v11, %v116_v57  ;;  %v249_v18 = vand.u32 4294901760, %v248_v33  ;;  %v256_v35 = vand.u32 4294901760, %v255_v0  ;;  %v1625_v34 = vpack.c.bf16 %v170_v29, %v167_v47  ;;  %v954_v11 = vld.sshfl [vmem:[%s1865_s2] sm:$0x33 pattern:$0x76325410] }
  0x39   :  { %1214 = vmatprep.subr.bf16.mxu1 %v1213_v36  ;;  %v1627_v44 = vsub.f32 %v61_v9, %v167_v47  ;;  %v374_v59 = vsub.f32 %v1567_v51, %v1886_v8  ;;  %v381_v13 = vsub.f32 %v1576_v55, %v1888_v6  ;;  %v122_v3 = vand.u32 4294901760, %v46_v1 }
  0x3a   :  { %1912 = vst [vmem:[#allocation11_spill] sm:$0xff] %v1625_v34  ;;  %v1215_v57 = vpack.c.bf16 %v256_v35, %v249_v18  ;;  %1194 = vmatprep.subr.bf16.mxu0 %v1625_v34  ;;  %v1639_v33 = vsub.f32 %v62_v54, %v170_v29  ;;  %v1889_v36 = vand.u32 4294901760, %v1582_v61  ;;  %v1892_v9 = vand.u32 4294901760, %v1593_v56 }
  0x3b   :  { %v375_v0 = vand.u32 4294901760, %v374_v59  ;;  %v382_v47 = vand.u32 4294901760, %v381_v13  ;;  %v1643_v8 = vpack.c.bf16 %v122_v3, %v119_v24  ;;  %v1645_v41 = vsub.f32 %v45_v37, %v119_v24 }
  0x3c   :  { %1216 = vmatpush3.bf16.msra.mxu1 %v1215_v57  ;;  %v262_v6 = vsub.f32 %v1582_v61, %v1889_v36  ;;  %v269_v35 = vsub.f32 %v1593_v56, %v1892_v9  ;;  %v73_v54 = vcombine.high %v954_v11, %v954_v11  ;;  %v1653_v29 = vand.u32 4294901760, %v954_v11 }
  0x3d   :  { %1913 = vst [vmem:[#allocation12_spill] sm:$0xff] %v1643_v8  ;;  %v1217_v18 = vpack.c.bf16 %v382_v47, %v375_v0  ;;  %1196 = vmatpush3.bf16.msra.mxu0 %v1643_v8  ;;  %v1895_v59 = vand.u32 4294901760, %v1597_v10  ;;  %v1898_v37 = vand.u32 4294901760, %v1606_v2  ;;  %v1229_v24 = vpack.c.bf16 %v1467_v32, %v1465_v31 }
  0x3e   :  { %v263_v13 = vand.u32 4294901760, %v262_v6  ;;  %v270_v57 = vand.u32 4294901760, %v269_v35  ;;  %v1660_v36 = vand.u32 4294901760, %v73_v54  ;;  %v1663_v34 = vsub.f32 %v954_v11, %v1653_v29 }
  0x3f   :  { %1218 = vmatprep.subr.bf16.mxu1 %v1217_v18  ;;  %v388_v0 = vsub.f32 %v1597_v10, %v1895_v59  ;;  %v395_v47 = vsub.f32 %v1606_v2, %v1898_v37  ;;  %1230 = vmatprep.subr.bf16.mxu0 %v1229_v24  ;;  %v1899_v9 = vand.u32 4294901760, %v1612_v53  ;;  %v1900_v6 = vand.u32 4294901760, %v1623_v19 }
  0x40   :  { %1914 = vst [vmem:[#allocation13_spill] sm:$0xff] %v1660_v36  ;;  %1915 = vst [vmem:[#allocation14_spill] sm:$0xff] %v1663_v34  ;;  %v1673_v35 = vsub.f32 %v46_v1, %v122_v3  ;;  %v1219_v8 = vpack.c.bf16 %v270_v57, %v263_v13  ;;  %v1676_v11 = vsub.f32 %v73_v54, %v1660_v36  ;;  %v1903_v18 = vand.u32 4294901760, %v1663_v34 }
  0x41   :  { %413 = vmatprep.mubr.f32.mxu1 %v1660_v36  ;;  %v389_v59 = vand.u32 4294901760, %v388_v0  ;;  %v396_v52 = vand.u32 4294901760, %v395_v47  ;;  %v276_v24 = vsub.f32 %v1612_v53, %v1899_v9  ;;  %v283_v37 = vsub.f32 %v1623_v19, %v1900_v6 }
  0x42   :  { %1220 = vmatpush3.bf16.msra.mxu1 %v1219_v8  ;;  %v174_v1 = vand.u32 4294901760, %v1676_v11  ;;  %v181_v3 = vsub.f32 %v1663_v34, %v1903_v18  ;;  %v1908_v54 = vand.u32 4294901760, %v1627_v44  ;;  %v408_v13 = vand.u32 4294901760, %v1639_v33 }
  0x43   :  { %v1221_v57 = vpack.c.bf16 %v396_v52, %v389_v59  ;;  %v277_v0 = vand.u32 4294901760, %v276_v24  ;;  %v284_v47 = vand.u32 4294901760, %v283_v37  ;;  %v1909_v34 = vand.u32 4294901760, %v1645_v41 }
  0x44   :  { %v175_v9 = vsub.f32 %v1676_v11, %v174_v1  ;;  %v402_v6 = vsub.f32 %v1627_v44, %v1908_v54  ;;  %v409_v8 = vsub.f32 %v1639_v33, %v408_v13  ;;  %v182_v36 = vand.u32 4294901760, %v181_v3 }
  0x45   :  { %1222 = vmatprep.subr.bf16.mxu1 %v1221_v57  ;;  %v1223_v18 = vpack.c.bf16 %v284_v47, %v277_v0  ;;  %v296_v7 = vand.u32 4294901760, %v1673_v35  ;;  %v1231_v59 = vpack.c.bf16 %v1451_v21, %v1447_v15  ;;  %v1233_v54 = vpack.c.bf16 %v1458_v26, %v1456_v25 }
  0x46   :  { %v176_v52 = vand.u32 4294901760, %v175_v9  ;;  %v403_v37 = vand.u32 4294901760, %v402_v6  ;;  %v410_v24 = vand.u32 4294901760, %v409_v8  ;;  %v290_v57 = vsub.f32 %v1645_v41, %v1909_v34 }
  0x47   :  { %1224 = vmatpush3.bf16.msra.mxu1 %v1223_v18  ;;  %v297_v3 = vsub.f32 %v1673_v35, %v296_v7  ;;  %v1235_v6 = vpack.c.bf16 %v1472_v38, %v1462_v28  ;;  %v1237_v18 = vpack.c.bf16 %v1479_v43, %v1476_v40  ;;  %v1239_v34 = vpack.c.bf16 %v1502_v58, %v1484_v46 }
  0x48   :  { %177 = vmatprep.mubr.f32.mxu0 %v176_v52  ;;  %v1225_v0 = vpack.c.bf16 %v410_v24, %v403_v37  ;;  %v291_v9 = vand.u32 4294901760, %v290_v57  ;;  %v1916_v52 = vand.u32 4294901760, %v1465_v31  ;;  %v1919_v24 = vand.u32 4294901760, %v1451_v21 }
  0x49   :  { %183 = vmatmul.mubr.f32.vlgmr.msra.gmra.mrb[0].mxu0 %v182_v36  ;;  %v298_v47 = vand.u32 4294901760, %v297_v3  ;;  %v1917_v36 = vand.u32 4294901760, %v1467_v32  ;;  %v1920_v3 = vand.u32 4294901760, %v1456_v25  ;;  %v1924_v31 = vand.u32 4294901760, %v1476_v40 }
  0x4a   :  { %1232 = vmatpush3.bf16.msra.mxu0 %v1231_v59  ;;  %1226 = vmatprep.subr.bf16.mxu1 %v1225_v0  ;;  %v1918_v59 = vand.u32 4294901760, %v1447_v15  ;;  %v1925_v32 = vand.u32 4294901760, %v1479_v43  ;;  %v1926_v15 = vand.u32 4294901760, %v1484_v46  ;;  %v1927_v21 = vand.u32 4294901760, %v1502_v58 }
  0x4b   :  { %1234 = vmatprep.subr.bf16.mxu0 %v1233_v54  ;;  %v1227_v8 = vpack.c.bf16 %v298_v47, %v291_v9  ;;  %550 = vmatprep.mubr.f32.mxu0 %v1676_v11  ;;  %v1293_v37 = vpack.c.bf16 %v1917_v36, %v1916_v52  ;;  %v1921_v54 = vand.u32 4294901760, %v1458_v26  ;;  %v1922_v9 = vand.u32 4294901760, %v1462_v28 }
  0x4c   :  { %v1295_v57 = vpack.c.bf16 %v1919_v24, %v1918_v59  ;;  %v1923_v47 = vand.u32 4294901760, %v1472_v38  ;;  %v1301_v52 = vpack.c.bf16 %v1925_v32, %v1924_v31  ;;  %v1303_v36 = vpack.c.bf16 %v1927_v21, %v1926_v15 }
  0x4d   :  { %v1297_v0 = vpack.c.bf16 %v1921_v54, %v1920_v3  ;;  %1228 = vmatpush3.bf16.msra.mxu1 %v1227_v8  ;;  %v1928_v25 = vand.u32 4294901760, %v1506_v63  ;;  %v1929_v26 = vand.u32 4294901760, %v1518_v12  ;;  %v1930_v28 = vand.u32 4294901760, %v1522_v17 }
  0x4e   :  { %v1299_v11 = vpack.c.bf16 %v1923_v47, %v1922_v9  ;;  %v1931_v38 = vand.u32 4294901760, %v1533_v42  ;;  %v1932_v40 = vand.u32 4294901760, %v1537_v50  ;;  %v1933_v43 = vand.u32 4294901760, %v1546_v60  ;;  %1236 = vmatpush3.bf16.msra.mxu0 %v1235_v6  ;;  %1262 = vmatprep.subr.bf16.mxu1 %v1445_v14 }
  0x4f   :  { %v1305_v59 = vpack.c.bf16 %v1929_v26, %v1928_v25  ;;  %v1934_v46 = vand.u32 4294901760, %v1552_v5  ;;  %v1935_v58 = vand.u32 4294901760, %v1563_v30  ;;  %v1936_v54 = vand.u32 4294901760, %v1567_v51  ;;  %1238 = vmatprep.subr.bf16.mxu0 %v1237_v18 }
  0x50   :  { %v1307_v24 = vpack.c.bf16 %v1931_v38, %v1930_v28  ;;  %v1309_v8 = vpack.c.bf16 %v1933_v43, %v1932_v40  ;;  %v1937_v9 = vand.u32 4294901760, %v1576_v55  ;;  %v1938_v31 = vand.u32 4294901760, %v1582_v61  ;;  %415 = vmatmul.mubr.f32.vlgmr.msra.gmra.mrb[0].mxu1 %v1653_v29 }
  0x51   :  { %v1311_v3 = vpack.c.bf16 %v1935_v58, %v1934_v46  ;;  %v1939_v32 = vand.u32 4294901760, %v1593_v56  ;;  %v1241_v6 = vpack.c.bf16 %v1518_v12, %v1506_v63  ;;  %v1940_v21 = vand.u32 4294901760, %v1612_v53  ;;  %1264 = vmatpush3.bf16.msra.mxu1 %v1449_v20  ;;  %657 = vmatprep.mubr.f32.mxu1 %v174_v1 }
  0x52   :  { %v1313_v47 = vpack.c.bf16 %v1937_v9, %v1936_v54  ;;  %v1941_v25 = vand.u32 4294901760, %v1623_v19  ;;  %1240 = vmatpush3.bf16.msra.mxu0 %v1239_v34  ;;  %1266 = vmatprep.subr.bf16.mxu1 %v1453_v22  ;;  %v1243_v18 = vpack.c.bf16 %v1533_v42, %v1522_v17  ;;  %v1245_v63 = vpack.c.bf16 %v1546_v60, %v1537_v50 }
  0x53   :  { %v1767_v15 = vpack.c.bf16 %v1939_v32, %v1938_v31  ;;  %1242 = vmatprep.subr.bf16.mxu0 %v1241_v6  ;;  %v1247_v12 = vpack.c.bf16 %v1563_v30, %v1552_v5  ;;  %v1249_v34 = vpack.c.bf16 %v1576_v55, %v1567_v51  ;;  %v1251_v17 = vpack.c.bf16 %v1593_v56, %v1582_v61  ;;  %v1942_v5 = vld [vmem:[#allocation9_spill] sm:$0xff]  ;;  %v1944_v30 = vld [vmem:[#allocation10_spill] sm:$0xff]  ;;  %v1945_v51 = vld [vmem:[#allocation11_spill] sm:$0xff] }
  0x54   :  { %v1775_v26 = vpack.c.bf16 %v1941_v25, %v1940_v21  ;;  %v1253_v42 = vpack.c.bf16 %v1606_v2, %v1597_v10  ;;  %v1255_v50 = vpack.c.bf16 %v1623_v19, %v1612_v53  ;;  %v1257_v60 = vpack.c.bf16 %v1639_v33, %v1627_v44  ;;  %v1943_v53 = vld [vmem:[#allocation14_spill] sm:$0xff]  ;;  %v1946_v55 = vld [vmem:[#allocation13_spill] sm:$0xff]  ;;  %v1947_v56 = vld [vmem:[#allocation12_spill] sm:$0xff] }
  0x55   :  { %1268 = vmatpush3.bf16.msra.mxu1 %v1460_v27  ;;  %v1259_v61 = vpack.c.bf16 %v1673_v35, %v1645_v41  ;;  %v1948_v19 = vand.u32 4294901760, %v1943_v53 }
  0x56   :  { %1244 = vmatpush3.bf16.msra.mxu0 %v1243_v18  ;;  %1270 = vmatprep.subr.bf16.mxu1 %v1474_v39 }
  0x57   :  { %1246 = vmatprep.subr.bf16.mxu0 %v1245_v63 }
  0x59   :  { %1272 = vmatpush3.bf16.msra.mxu1 %v1482_v45 }
  0x5a   :  { %1248 = vmatpush3.bf16.msra.mxu0 %v1247_v12  ;;  %1274 = vmatprep.subr.bf16.mxu1 %v1504_v62 }
  0x5b   :  { %1250 = vmatprep.subr.bf16.mxu0 %v1249_v34 }
  0x5d   :  { %1276 = vmatpush3.bf16.msra.mxu1 %v1520_v16 }
  0x5e   :  { %1252 = vmatpush3.bf16.msra.mxu0 %v1251_v17  ;;  %1278 = vmatprep.subr.bf16.mxu1 %v1535_v49 }
  0x5f   :  { %1254 = vmatprep.subr.bf16.mxu0 %v1253_v42 }
  0x61   :  { %1280 = vmatpush3.bf16.msra.mxu1 %v1550_v4 }
  0x62   :  { %1256 = vmatpush3.bf16.msra.mxu0 %v1255_v50  ;;  %1282 = vmatprep.subr.bf16.mxu1 %v1565_v48 }
  0x63   :  { %1258 = vmatprep.subr.bf16.mxu0 %v1257_v60 }
  0x65   :  { %1284 = vmatpush3.bf16.msra.mxu1 %v1580_v23 }
  0x66   :  { %1260 = vmatpush3.bf16.msra.mxu0 %v1259_v61  ;;  %1286 = vmatprep.subr.bf16.mxu1 %v1942_v5 }
  0x67   :  { %1294 = vmatprep.subr.bf16.mxu0 %v1293_v37 }
  0x69   :  { %553 = vmatmul.mubr.f32.vlgmr.msra.gmra.mrb[2].mxu0 %v1943_v53  ;;  %1288 = vmatpush3.bf16.msra.mxu1 %v1944_v30 }
  0x6a   :  { %1296 = vmatpush3.bf16.msra.mxu0 %v1295_v57  ;;  %1290 = vmatprep.subr.bf16.mxu1 %v1945_v51 }
  0x6b   :  { %1298 = vmatprep.subr.bf16.mxu0 %v1297_v0  ;;  %827 = vmatprep.mubr.f32.mxu0 %v1946_v55 }
  0x6d   :  { %1292 = vmatpush3.bf16.msra.mxu1 %v1947_v56 }
  0x6e   :  { %1300 = vmatpush3.bf16.msra.mxu0 %v1299_v11  ;;  %1326 = vmatprep.subr.bf16.mxu1 %v1445_v14  ;;  %v1949_v14 = vand.u32 4294901760, %v1597_v10  ;;  %v64_v10 = vstv %s1863_s0  ;;  %s1412_s0 = smov [#allocation6]  }
  0x6f   :  { %1302 = vmatprep.subr.bf16.mxu0 %v1301_v52  ;;  %s945_s28 = sshll.u32 %s1412_s0, 4  ;;  %s946_s28 = int_to_ptr.vmem [resolvable:$true] %s945_s28 }
  0x70   :  { %661 = vmatmul.mubr.f32.vlgmr.msra.gmra.mrb[2].mxu1 %v1948_v19  ;;  %s1383_s29 = scalar_lea.vmem %s946_s28, 32  ;;  %p1388_p9 = scmp.lt.s32.totalorder %s946_s28, %s946_s28 }
  0x71   :  { %1328 = vmatpush3.bf16.msra.mxu1 %v1449_v20  ;;  %931 = vmatprep.mubr.f32.mxu1 %v1946_v55  ;;  %v1950_v20 = vand.u32 4294901760, %v1606_v2  ;;  %p1384_p8 = scmp.ne.s32.totalorder %s946_s28, %s1383_s29  ;;  %p1389_p10 = scmp.lt.s32.totalorder %s1383_s29, %s1383_s29 }
  0x72   :  { %1304 = vmatpush3.bf16.msra.mxu0 %v1303_v36  ;;  %1330 = vmatprep.subr.bf16.mxu1 %v1453_v22  ;;  %v1951_v22 = vand.u32 4294901760, %v1627_v44 }
  0x73   :  { %1306 = vmatprep.subr.bf16.mxu0 %v1305_v59  ;;  %v1317_v1 = vpack.c.bf16 %v1950_v20, %v1949_v14  ;;  %p1390_p11 = por %p1389_p10, %p1388_p9 }
  0x75   :  { %1332 = vmatpush3.bf16.msra.mxu1 %v1460_v27  ;;  %v1321_v27 = vpack.c.bf16 %v408_v13, %v1951_v22  ;;  %p1391_p12 = pnand %p1390_p11, %p1384_p8 }
  0x76   :  { %1308 = vmatpush3.bf16.msra.mxu0 %v1307_v24  ;;  %1334 = vmatprep.subr.bf16.mxu1 %v1474_v39  ;;  %v1952_v39 = vand.u32 4294901760, %v1645_v41 }
  0x77   :  { %1310 = vmatprep.subr.bf16.mxu0 %v1309_v8 }
  0x79   :  { %1336 = vmatpush3.bf16.msra.mxu1 %v1482_v45  ;;  %v1323_v45 = vpack.c.bf16 %v296_v7, %v1952_v39 }
  0x7a   :  { %1312 = vmatpush3.bf16.msra.mxu0 %v1311_v3  ;;  %1338 = vmatprep.subr.bf16.mxu1 %v1504_v62 }
  0x7b   :  { %1314 = vmatprep.subr.bf16.mxu0 %v1313_v47 }
  0x7d   :  { %1340 = vmatpush3.bf16.msra.mxu1 %v1520_v16 }
  0x7e   :  { %1316 = vmatpush3.bf16.msra.mxu0 %v1767_v15  ;;  %1342 = vmatprep.subr.bf16.mxu1 %v1535_v49 }
  0x7f   :  { %1318 = vmatprep.subr.bf16.mxu0 %v1317_v1 }
  0x81   :  { %1344 = vmatpush3.bf16.msra.mxu1 %v1550_v4 }
  0x82   :  { %1320 = vmatpush3.bf16.msra.mxu0 %v1775_v26  ;;  %1346 = vmatprep.subr.bf16.mxu1 %v1565_v48 }
  0x83   :  { %1322 = vmatprep.subr.bf16.mxu0 %v1321_v27 }
  0x85   :  { %1348 = vmatpush3.bf16.msra.mxu1 %v1580_v23 }
  0x86   :  { %1324 = vmatpush3.bf16.msra.mxu0 %v1323_v45  ;;  %1350 = vmatprep.subr.bf16.mxu1 %v1942_v5 }
  0x89   :  { %829 = vmatmul.mubr.f32.vlgmr.msra.gmra.mrb[4].mxu0 %v1653_v29  ;;  %1352 = vmatpush3.bf16.msra.mxu1 %v1944_v30 }
  0x8a   :  { %1354 = vmatprep.subr.bf16.mxu1 %v1945_v51 }
  0x8d   :  { %1356 = vmatpush3.bf16.msra.mxu1 %v1947_v56 }
  0x90   :  { %933 = vmatmul.mubr.f32.vlgmr.msra.gmra.mrb[4].mxu1 %v1653_v29 }
 0x11c   :  { %v987_v41 = vpop.f32.mrb[0].mxu0 }
 0x11d   :  { %v988_v44 = vpop.f32.mrb[1].mxu0 }
 0x11e   :  { %v989_v62 = vadd.f32 %v988_v44, %v987_v41 }
 0x120   :  { %v185_v16 = vadd.f32 %v989_v62, %v64_v10 }
 0x123   :  { %v1022_v49 = vpop.f32.mrb[0].mxu1 }
 0x124   :  { %v1023_v4 = vpop.f32.mrb[1].mxu1 }
 0x125   :  { %v1024_v23 = vadd.f32 %v1023_v4, %v1022_v49 }
 0x127   :  { %v417_v48 = vadd.f32 %v1024_v23, %v185_v16 }
 0x13c   :  { %v1057_v7 = vpop.f32.mrb[2].mxu0 }
 0x13d   :  { %v1058_v2 = vpop.f32.mrb[3].mxu0 }
 0x13e   :  { %v1059_v33 = vadd.f32 %v1058_v2, %v1057_v7 }
 0x140   :  { %v555_v35 = vadd.f32 %v1059_v33, %v417_v48 }
 0x143   :  { %v1092_v13 = vpop.f32.mrb[2].mxu1 }
 0x144   :  { %v1093_v37 = vpop.f32.mrb[3].mxu1 }
 0x145   :  { %v1094_v57 = vadd.f32 %v1093_v37, %v1092_v13 }
 0x147   :  { %v663_v29 = vadd.f32 %v1094_v57, %v555_v35 }
 0x15c   :  { %v1127_v0 = vpop.f32.mrb[4].mxu0 }
 0x15d   :  { %v1128_v11 = vpop.f32.mrb[5].mxu0 }
 0x15e   :  { %v1129_v52 = vadd.f32 %v1128_v11, %v1127_v0 }
 0x160   :  { %v831_v36 = vadd.f32 %v1129_v52, %v663_v29 }
 0x163   :  { %v1162_v59 = vpop.f32.mrb[4].mxu1 }
 0x164   :  { %v1163_v28 = vpop.f32.mrb[5].mxu1 }
 0x165   :  { %v1164_v38 = vadd.f32 %v1163_v28, %v1162_v59 }
 0x167   :  { %v935_v24 = vadd.f32 %v1164_v38, %v831_v36 }
 0x169   :  { %938 = vst [vmem:[#allocation6] sm:$0x3] %v935_v24 }
 0x16a   :  { %1394 = shalt.err (!%p1391_p12)
}
 0x16b   :  { %s1395_s5 = scalar_lea.hbm %s1866_s3, 32 }
 0x16c   :  { %p1396_p13 = scmp.ne.s32.totalorder %s1866_s3, %s1395_s5  ;;  %p1399_p0 = scmp.lt.u32.totalorder %s1395_s5, %s1866_s3 }
 0x16e   :  { %p1401_p1 = pnand %p1399_p0, %p1396_p13 }
 0x170   :  { %1404 = shalt.err (!%p1401_p1)
}
 0x171   :  { %948 = dma.vmem_to_hbm [thread:$0]  %s946_s28, 32, %s1866_s3, [#allocation5]  }
 0x172   :  { %1407 = dma.done.wait [#allocation5], 32  }
 0x173   :  { %1408 = vsyncadd [#allocation5], 4294967264 }
 0x174   :  { %952 = vsyncpa [#allocation4], 1 }
 0x175   :  { %953 = vsyncpa [#allocation5], 1 }

</bundles_post_ra>
